<compile_context>
chip_gen: v6e
topology: v6e:2x2x1
jax: 0.10.0
libtpu: 0.0.40
codegen_flags: <defaults>
</compile_context>

<pallas_src>
import functools

import jax
import jax.numpy as jnp
from jax.experimental import pallas as pl
from jax.experimental.pallas import tpu as pltpu

LANE = 128          # OUT dims padded to full lanes (lane-dense stores, full MXU cols)
SUBLANE_BF16 = 16   # bf16 sublane multiple: weight IN (contraction) dims pad to this


def _pad_to(n, m):
    return ((n + m - 1) // m) * m


# ---------------------------------------------------------------------------
# Fused Pallas kernel: whole forward pass in one invocation, no grid
# ---------------------------------------------------------------------------

def _fused_forward_kernel(x_ref, w_ref, b_ref, out_ref, *, layer_rows, n_trunk):
    """x_ref   : (M, K0p)              f32  input (lanes beyond real K are zero)
       w_ref   : (sum(layer_rows),128) bf16 all weights stacked along rows; each
                                            layer's rows padded to 16 (tile-aligned)
       b_ref   : (n_layers, 128)       f32  one bias row per layer, zero-padded
       out_ref : (M, 256)              f32  [:, :128] = F.normalize(trunk_out)
                                            [:, 128:] = sigmoid(relu(clf_out))"""
    b_all = b_ref[...]                     # tiny; single load
    x = x_ref[...]                         # activations stay f32 between layers
    off = 0
    for i, kp in enumerate(layer_rows):
        w = w_ref[off:off + kp, :]         # static, 16-row-aligned slice -> free
        off += kp
        # Only the MXU operands go bf16; contract over the first kp lanes.
        # Lanes >= real K are exactly zero on both sides, so this is exact.
        y = jnp.dot(x[:, :kp].astype(jnp.bfloat16), w,
                    preferred_element_type=jnp.float32)
        x = jnp.maximum(y + b_all[i:i + 1, :], 0.0)         # (M, 128) f32
        if i == n_trunk - 1:
            # F.normalize(p=2, dim=1); padded lanes are zero -> norm is exact.
            s = jnp.sum(x * x, axis=1, keepdims=True)
            inv = jax.lax.rsqrt(jnp.maximum(s, 1e-24))      # == 1/max(||x||,1e-12), EUP
            out_ref[:, :LANE] = (x * inv).astype(out_ref.dtype)
    # After the loop, x = relu of the LAST classifier layer (the PyTorch module
    # applies F.relu to every Classifier_FC layer), then sigmoid.
    out_ref[:, LANE:] = jax.nn.sigmoid(x).astype(out_ref.dtype)


# ---------------------------------------------------------------------------
# Parameter construction (deterministic, in-script)
# ---------------------------------------------------------------------------

def make_params(key, linear_widths, classifier_layers):
    """Returns {'raw': per-layer f32 (W^T, b), 'packed': fused kernel operands}.

    Weights are stored PRE-TRANSPOSED as (in, out) == PyTorch weight.T.
    Trunk: xavier_normal (gain=1), bias = 0.01 (as in __init__); classifier init
    values do not affect forward semantics (deterministic example params)."""
    raw = {"trunk": [], "clf": []}

    def xavier_normal(k, fi, fo):
        std = (2.0 / (fi + fo)) ** 0.5
        return std * jax.random.normal(k, (fi, fo), dtype=jnp.float32)

    for i in range(1, len(linear_widths)):
        key, sub = jax.random.split(key)
        fi, fo = linear_widths[i - 1], linear_widths[i]
        raw["trunk"].append((xavier_normal(sub, fi, fo),
                             jnp.full((fo,), 0.01, dtype=jnp.float32)))

    clf_dims = [linear_widths[-1]] + list(classifier_layers)
    for i in range(1, len(clf_dims)):
        key, sub = jax.random.split(key)
        fi, fo = clf_dims[i - 1], clf_dims[i]
        raw["clf"].append((xavier_normal(sub, fi, fo),
                           jnp.zeros((fo,), dtype=jnp.float32)))

    layers = raw["trunk"] + raw["clf"]
    layer_rows, w_blocks, b_rows = [], [], []
    for w, b in layers:
        fi, fo = w.shape
        kp = _pad_to(fi, SUBLANE_BF16)
        layer_rows.append(kp)
        wp = jnp.zeros((kp, LANE), jnp.bfloat16).at[:fi, :fo].set(w.astype(jnp.bfloat16))
        w_blocks.append(wp)
        b_rows.append(jnp.zeros((LANE,), jnp.float32).at[:fo].set(b))

    packed = {
        "w": jnp.concatenate(w_blocks, axis=0),   # (sum kp, 128) bf16 -> ONE weight DMA
        "b": jnp.stack(b_rows, axis=0),           # (n_layers, 128) f32 -> ONE bias DMA
        "layer_rows": tuple(layer_rows),
        "n_trunk": len(raw["trunk"]),
        "real_dims": tuple((w.shape[0], w.shape[1]) for w, _ in layers),
    }
    return {"raw": raw, "packed": packed}


# ---------------------------------------------------------------------------
# Full forward pass: one pallas_call, merged output split back to real widths
# ---------------------------------------------------------------------------

def simplenet_forward(packed, input_sample, out_dim, clf_out_dim):
    M, K = input_sample.shape
    layer_rows = packed["layer_rows"]
    k0p = layer_rows[0]
    x_p = input_sample if K == k0p else jnp.pad(input_sample, ((0, 0), (0, k0p - K)))

    # Honest (unpadded) cost estimate — advisory for XLA scheduling.
    real_dims = packed["real_dims"]
    flops = sum(2 * M * fi * fo for fi, fo in real_dims)
    transcendentals = M * clf_out_dim + M                      # sigmoid + rsqrt
    bytes_accessed = (M * K * 4
                      + sum(fi * fo for fi, fo in real_dims) * 2   # bf16 weights
                      + sum(fo for _, fo in real_dims) * 4         # f32 biases
                      + M * (out_dim + clf_out_dim) * 4)           # f32 outputs
    cost = pl.CostEstimate(flops=flops, transcendentals=transcendentals,
                           bytes_accessed=bytes_accessed)

    kernel = functools.partial(_fused_forward_kernel,
                               layer_rows=layer_rows, n_trunk=packed["n_trunk"])

    vmem = pltpu.MemorySpace.VMEM
    fused = pl.pallas_call(
        kernel,
        out_shape=jax.ShapeDtypeStruct((M, 2 * LANE), jnp.float32),
        in_specs=[pl.BlockSpec(memory_space=vmem)] * 3,   # whole arrays, no pipeline scaffolding
        out_specs=pl.BlockSpec(memory_space=vmem),
        cost_estimate=cost,
    )(x_p, packed["w"], packed["b"])

    # TODO(synk): at production widths, stream one layer's weights at a time with
    # pltpu.emit_pipeline (activation stays resident), set
    # pltpu.CompilerParams(vmem_limit_bytes=...) against v7x's 64 MiB VMEM, and only
    # add a "parallel" M grid axis once each core gets >= a few 256-row tiles.
    return fused[:, :out_dim], fused[:, LANE:LANE + clf_out_dim]


# ---------------------------------------------------------------------------
# Reference (plain JAX) — mimics the kernel's bf16 MXU operands, f32 elsewhere
# ---------------------------------------------------------------------------

def reference_forward(raw, input_sample):
    layers = raw["trunk"] + raw["clf"]
    x = input_sample
    feat = None
    for i, (w, b) in enumerate(layers):
        y = jnp.dot(x.astype(jnp.bfloat16), w.astype(jnp.bfloat16),
                    preferred_element_type=jnp.float32)
        x = jnp.maximum(y + b, 0.0)
        if i == len(raw["trunk"]) - 1:
            feat = x
    nrm = jnp.sqrt(jnp.sum(feat * feat, axis=1, keepdims=True))
    x_out = feat / jnp.maximum(nrm, 1e-12)
    h_out = jax.nn.sigmoid(x)
    return x_out, h_out


if __name__ == "__main__":
    # Shapes consistent with the module:
    #   input_dim = 32, linear_widths = [32, 64, 16], output_dim = 16
    #   classifier_layers = [24, 8], batch = 8
    batch = 8
    linear_widths = [32, 64, 16]
    classifier_layers = [24, 8]

    key = jax.random.PRNGKey(0)
    key, pkey, xkey = jax.random.split(key, 3)

    params = make_params(pkey, linear_widths, classifier_layers)
    x_in = jax.random.normal(xkey, (batch, linear_widths[0]), dtype=jnp.float32)

    x_out, h_out = simplenet_forward(params["packed"], x_in,
                                     out_dim=linear_widths[-1],
                                     clf_out_dim=classifier_layers[-1])
    x_out = jax.block_until_ready(x_out)
    h_out = jax.block_until_ready(h_out)

    # Sanity check against a plain-JAX reference that uses the same bf16 MXU
    # operands (only accumulation-order / approximate-rsqrt differences remain).
    x_ref, h_ref = reference_forward(params["raw"], x_in)
    assert x_out.shape == (batch, linear_widths[-1])
    assert h_out.shape == (batch, classifier_layers[-1])
    assert jnp.allclose(x_out, x_ref, atol=1e-3, rtol=1e-3), float(jnp.max(jnp.abs(x_out - x_ref)))
    assert jnp.allclose(h_out, h_ref, atol=1e-3, rtol=1e-3), float(jnp.max(jnp.abs(h_out - h_ref)))

    print("KERNEL_OK")
</pallas_src>

<mosaic_0001>
module attributes {stable_mosaic.version = 11 : i64} {
  func.func @_fused_forward_kernel(%arg0: memref<8x32xf32, #tpu.memory_space<vmem>>, %arg1: memref<144x128xbf16, #tpu.memory_space<vmem>>, %arg2: memref<4x128xf32, #tpu.memory_space<vmem>>, %arg3: memref<8x256xf32, #tpu.memory_space<vmem>>) attributes {dimension_semantics = [], scalar_prefetch = 0 : i64, scratch_operands = 0 : i64, tpu.core_type = #tpu.core_type<tc>} {
    %c0 = arith.constant 0 : index
    %c0_0 = arith.constant 0 : index
    %0 = vector.load %arg2[%c0, %c0_0] : memref<4x128xf32, #tpu.memory_space<vmem>>, vector<4x128xf32>
    %c0_1 = arith.constant 0 : index
    %c0_2 = arith.constant 0 : index
    %1 = vector.load %arg0[%c0_1, %c0_2] : memref<8x32xf32, #tpu.memory_space<vmem>>, vector<8x32xf32>
    %c0_3 = arith.constant 0 : index
    %c0_4 = arith.constant 0 : index
    %2 = vector.load %arg1[%c0_3, %c0_4] : memref<144x128xbf16, #tpu.memory_space<vmem>>, vector<32x128xbf16>
    %3 = arith.truncf %1 : vector<8x32xf32> to vector<8x32xbf16>
    %cst = arith.constant dense<0.000000e+00> : vector<8x128xf32>
    %4 = tpu.matmul %3, %2, %cst {dimension_numbers = #tpu.dot_dimension_numbers<[1], [0], [0], [1], [0, 0, 1, 1], [], []>} : vector<8x32xbf16>, vector<32x128xbf16>, vector<8x128xf32> -> vector<8x128xf32>
    %5 = vector.extract_strided_slice %0 {offsets = [0, 0], sizes = [1, 128], strides = [1, 1]} : vector<4x128xf32> to vector<1x128xf32>
    %6 = vector.broadcast %5 : vector<1x128xf32> to vector<8x128xf32>
    %7 = arith.addf %4, %6 : vector<8x128xf32>
    %cst_5 = arith.constant 0.000000e+00 : f32
    %8 = vector.broadcast %cst_5 : f32 to vector<8x128xf32>
    %9 = arith.maximumf %7, %8 : vector<8x128xf32>
    %c32 = arith.constant 32 : index
    %c0_6 = arith.constant 0 : index
    %10 = vector.load %arg1[%c32, %c0_6] : memref<144x128xbf16, #tpu.memory_space<vmem>>, vector<64x128xbf16>
    %11 = vector.extract_strided_slice %9 {offsets = [0, 0], sizes = [8, 64], strides = [1, 1]} : vector<8x128xf32> to vector<8x64xf32>
    %12 = arith.truncf %11 : vector<8x64xf32> to vector<8x64xbf16>
    %cst_7 = arith.constant dense<0.000000e+00> : vector<8x128xf32>
    %13 = tpu.matmul %12, %10, %cst_7 {dimension_numbers = #tpu.dot_dimension_numbers<[1], [0], [0], [1], [0, 0, 1, 1], [], []>} : vector<8x64xbf16>, vector<64x128xbf16>, vector<8x128xf32> -> vector<8x128xf32>
    %14 = vector.extract_strided_slice %0 {offsets = [1, 0], sizes = [1, 128], strides = [1, 1]} : vector<4x128xf32> to vector<1x128xf32>
    %15 = vector.broadcast %14 : vector<1x128xf32> to vector<8x128xf32>
    %16 = arith.addf %13, %15 : vector<8x128xf32>
    %cst_8 = arith.constant 0.000000e+00 : f32
    %17 = vector.broadcast %cst_8 : f32 to vector<8x128xf32>
    %18 = arith.maximumf %16, %17 : vector<8x128xf32>
    %19 = arith.mulf %18, %18 : vector<8x128xf32>
    %cst_9 = arith.constant dense<0.000000e+00> : vector<8xf32>
    %20 = vector.multi_reduction <add>, %19, %cst_9 [1] : vector<8x128xf32> to vector<8xf32>
    %21 = vector.shape_cast %20 : vector<8xf32> to vector<8x1xf32>
    %cst_10 = arith.constant 1.000000e-24 : f32
    %22 = vector.broadcast %cst_10 : f32 to vector<8x1xf32>
    %23 = arith.maximumf %21, %22 : vector<8x1xf32>
    %24 = math.rsqrt %23 : vector<8x1xf32>
    %25 = vector.broadcast %24 : vector<8x1xf32> to vector<8x128xf32>
    %26 = arith.mulf %18, %25 : vector<8x128xf32>
    %c0_11 = arith.constant 0 : index
    %c0_12 = arith.constant 0 : index
    %27 = vector.load %arg3[%c0_11, %c0_12] : memref<8x256xf32, #tpu.memory_space<vmem>>, vector<8x128xf32>
    tpu.vector_store %arg3[%c0_11, %c0_12], %26 {strides = array<i32>} : memref<8x256xf32, #tpu.memory_space<vmem>>, vector<8x128xf32>,
    %c96 = arith.constant 96 : index
    %c0_13 = arith.constant 0 : index
    %28 = vector.load %arg1[%c96, %c0_13] : memref<144x128xbf16, #tpu.memory_space<vmem>>, vector<16x128xbf16>
    %29 = vector.extract_strided_slice %18 {offsets = [0, 0], sizes = [8, 16], strides = [1, 1]} : vector<8x128xf32> to vector<8x16xf32>
    %30 = arith.truncf %29 : vector<8x16xf32> to vector<8x16xbf16>
    %cst_14 = arith.constant dense<0.000000e+00> : vector<8x128xf32>
    %31 = tpu.matmul %30, %28, %cst_14 {dimension_numbers = #tpu.dot_dimension_numbers<[1], [0], [0], [1], [0, 0, 1, 1], [], []>} : vector<8x16xbf16>, vector<16x128xbf16>, vector<8x128xf32> -> vector<8x128xf32>
    %32 = vector.extract_strided_slice %0 {offsets = [2, 0], sizes = [1, 128], strides = [1, 1]} : vector<4x128xf32> to vector<1x128xf32>
    %33 = vector.broadcast %32 : vector<1x128xf32> to vector<8x128xf32>
    %34 = arith.addf %31, %33 : vector<8x128xf32>
    %cst_15 = arith.constant 0.000000e+00 : f32
    %35 = vector.broadcast %cst_15 : f32 to vector<8x128xf32>
    %36 = arith.maximumf %34, %35 : vector<8x128xf32>
    %c112 = arith.constant 112 : index
    %c0_16 = arith.constant 0 : index
    %37 = vector.load %arg1[%c112, %c0_16] : memref<144x128xbf16, #tpu.memory_space<vmem>>, vector<32x128xbf16>
    %38 = vector.extract_strided_slice %36 {offsets = [0, 0], sizes = [8, 32], strides = [1, 1]} : vector<8x128xf32> to vector<8x32xf32>
    %39 = arith.truncf %38 : vector<8x32xf32> to vector<8x32xbf16>
    %cst_17 = arith.constant dense<0.000000e+00> : vector<8x128xf32>
    %40 = tpu.matmul %39, %37, %cst_17 {dimension_numbers = #tpu.dot_dimension_numbers<[1], [0], [0], [1], [0, 0, 1, 1], [], []>} : vector<8x32xbf16>, vector<32x128xbf16>, vector<8x128xf32> -> vector<8x128xf32>
    %41 = vector.extract_strided_slice %0 {offsets = [3, 0], sizes = [1, 128], strides = [1, 1]} : vector<4x128xf32> to vector<1x128xf32>
    %42 = vector.broadcast %41 : vector<1x128xf32> to vector<8x128xf32>
    %43 = arith.addf %40, %42 : vector<8x128xf32>
    %cst_18 = arith.constant 0.000000e+00 : f32
    %44 = vector.broadcast %cst_18 : f32 to vector<8x128xf32>
    %45 = arith.maximumf %43, %44 : vector<8x128xf32>
    %46 = arith.negf %45 : vector<8x128xf32>
    %47 = math.exp %46 : vector<8x128xf32>
    %cst_19 = arith.constant 1.000000e+00 : f32
    %48 = vector.broadcast %cst_19 : f32 to vector<8x128xf32>
    %49 = arith.addf %48, %47 : vector<8x128xf32>
    %50 = arith.divf %48, %49 : vector<8x128xf32>
    %c0_20 = arith.constant 0 : index
    %c128 = arith.constant 128 : index
    %51 = vector.load %arg3[%c0_20, %c128] : memref<8x256xf32, #tpu.memory_space<vmem>>, vector<8x128xf32>
    tpu.vector_store %arg3[%c0_20, %c128], %50 {strides = array<i32>} : memref<8x256xf32, #tpu.memory_space<vmem>>, vector<8x128xf32>,
    return
  }
}

</mosaic_0001>

<bundles_post_ra>
// kernel: tpu_custom_call.1
= control target key start
LH: loop header
LB: loop body
LE: loop exit
PB: predicated region body
PF: predicated region fallthrough
CT: control target
= control target key end

     0   :  { %8 = vsyncpa [#allocation3], 0  ;;  %s572_s0 = inlined_call_operand.hbm [shape: f32[8,32], index: 0, kind: input, shape index: {}]   ;;  %s573_s1 = inlined_call_operand.hbm [shape: bf16[144,128], index: 1, kind: input, shape index: {}]   ;;  %s574_s2 = inlined_call_operand.hbm [shape: f32[4,128], index: 2, kind: input, shape index: {}]   ;;  %s575_s3 = inlined_call_operand.hbm [shape: f32[8,256], index: 3, kind: output, shape index: {}]  }
   0x1   :  { %9 = vsyncpa [#allocation6], 0 }
   0x2   :  { %10 = vsyncpa [#allocation4], 0  ;;  %s526_s12 = smov [#allocation5]  }
   0x3   :  { %s26_s13 = sshll.u32 %s526_s12, 4  ;;  %s27_s13 = int_to_ptr.vmem [resolvable:$true] %s26_s13 }
   0x4   :  { %s448_s14 = scalar_lea.vmem %s27_s13, 1152  ;;  %p453_p1 = scmp.lt.s32.totalorder %s27_s13, %s27_s13 }
   0x5   :  { %p449_p0 = scmp.ne.s32.totalorder %s27_s13, %s448_s14  ;;  %p454_p2 = scmp.lt.s32.totalorder %s448_s14, %s448_s14 }
   0x7   :  { %p455_p3 = por %p454_p2, %p453_p1 }
   0x9   :  { %p456_p4 = pnand %p455_p3, %p449_p0 }
   0xb   :  { %459 = shalt.err (!%p456_p4)
}
   0xc   :  { %s527_s15 = smov 64   ;;  %s528_s16 = smov 4  }
   0xd   :  { %32 = dma.hbm_to_vmem [thread:$0]  %s573_s1, 1152, %s27_s13, [#allocation6], %s527_s15, %s527_s15, %s528_s16  }
   0xe   :  { %s529_s19 = smov [#allocation2]   ;;  %s530_s21 = smov [#allocation7]  }
   0xf   :  { %s17_s20 = sshll.u32 %s529_s19, 4  ;;  %s39_s22 = sshll.u32 %s530_s21, 4  ;;  %s18_s20 = int_to_ptr.vmem [resolvable:$true] %s17_s20  ;;  %s40_s22 = int_to_ptr.vmem [resolvable:$true] %s39_s22 }
  0x10   :  { %s468_s23 = scalar_lea.vmem %s18_s20, 128  ;;  %p473_p6 = scmp.lt.s32.totalorder %s18_s20, %s18_s20 }
  0x11   :  { %p469_p5 = scmp.ne.s32.totalorder %s18_s20, %s468_s23  ;;  %p474_p7 = scmp.lt.s32.totalorder %s468_s23, %s468_s23 }
  0x13   :  { %p475_p8 = por %p474_p7, %p473_p6 }
  0x15   :  { %p476_p9 = pnand %p475_p8, %p469_p5 }
  0x17   :  { %479 = shalt.err (!%p476_p9)
}
  0x18   :  { %20 = dma.hbm_to_vmem [thread:$0]  %s572_s0, 128, %s18_s20, [#allocation3]  }
  0x19   :  { %s488_s26 = scalar_lea.vmem %s40_s22, 64  ;;  %p493_p11 = scmp.lt.s32.totalorder %s40_s22, %s40_s22 }
  0x1a   :  { %p489_p10 = scmp.ne.s32.totalorder %s40_s22, %s488_s26  ;;  %p494_p12 = scmp.lt.s32.totalorder %s488_s26, %s488_s26 }
  0x1c   :  { %p495_p13 = por %p494_p12, %p493_p11 }
  0x1e   :  { %p496_p0 = pnand %p495_p13, %p489_p10 }
  0x20   :  { %499 = shalt.err (!%p496_p0)
}
  0x21   :  { %42 = dma.hbm_to_vmem [thread:$0]  %s574_s2, 64, %s40_s22, [#allocation6]  }
  0x22   :  { %520 = dma.done.wait [#allocation3], 128  }
  0x23   :  { %521 = vsyncadd [#allocation3], 4294967168 }
  0x24   :  { %522 = dma.done.wait [#allocation6], 1216  }
  0x25   :  { %523 = vsyncadd [#allocation6], 4294966080  ;;  %v531_v0 = vmov 0.0   ;;  %vm532_vm0 = vmmov 0   ;;  %v425_v1 = vld [vmem:[#allocation5 + $0x8] sm:$0xff]   ;;  %v426_v2 = vld [vmem:[#allocation5] sm:$0xff]   ;;  %v60_v10 = vlaneseq }
  0x26   :  { %383 = vmatprep.subr.bf16.mxu0 %v531_v0  ;;  %387 = vmatprep.mubr.msk.bf16.mxu0 %vm532_vm0, %v531_v0  ;;  %v54_v3 = vld [vmem:[#allocation2] sm:$0xff]  ;;  %v427_v4 = vld [vmem:[#allocation5 + $0x28] sm:$0xff]   ;;  %vm76_vm1 = vcmask 261120   ;;  %v428_v5 = vld [vmem:[#allocation5 + $0x20] sm:$0xff]   ;;  %vm158_vm2 = vcmask 523264   ;;  %vm223_vm3 = vcmask 130048  }
  0x27   :  { %391 = vmatprep.subr.bf16.mxu1 %v531_v0  ;;  %399 = vmatprep.mubr.msk.bf16.mxu1 %vm532_vm0, %v531_v0  ;;  %v59_v6 = vpack.c.bf16 %v54_v3, %v54_v3  ;;  %v429_v7 = vld [vmem:[#allocation5 + $0x18] sm:$0xff]   ;;  %v430_v8 = vld [vmem:[#allocation5 + $0x10] sm:$0xff]   ;;  %v61_v11 = vshrl.u32 %v60_v10, 7  ;;  %v53_v13 = vld [vmem:[#allocation7] sm:$0xf]  ;;  %s533_s0 = smov [#allocation8]  }
  0x28   :  { %384 = vmatpush3.bf16.msra.mxu0 %v425_v1  ;;  %392 = vmatpush3.bf16.msra.mxu1 %v427_v4  ;;  %v431_v9 = vld [vmem:[#allocation5 + $0x30] sm:$0xff]   ;;  %v432_v32 = vld [vmem:[#allocation5 + $0x40] sm:$0xff]   ;;  %v433_v33 = vld [vmem:[#allocation5 + $0x38] sm:$0xff]   ;;  %s346_s2 = sshll.u32 %s533_s0, 4  ;;  %s347_s2 = int_to_ptr.vmem [resolvable:$true] %s346_s2 }
  0x29   :  { %385 = vmatprep.subr.bf16.mxu0 %v531_v0  ;;  %393 = vmatprep.subr.bf16.mxu1 %v531_v0  ;;  %v62_v12 = vsub.s32 0, %v61_v11  ;;  %v132_v22 = vsub.s32 1, %v61_v11  ;;  %v215_v38 = vsub.s32 2, %v61_v11  ;;  %v275_v47 = vsub.s32 3, %v61_v11  ;;  %s500_s28 = scalar_lea.vmem %s347_s2, 256  ;;  %p505_p2 = scmp.lt.s32.totalorder %s347_s2, %s347_s2 }
  0x2a   :  { %p501_p1 = scmp.ne.s32.totalorder %s347_s2, %s500_s28  ;;  %p506_p3 = scmp.lt.s32.totalorder %s500_s28, %s500_s28 }
  0x2b   :  { %v63_v14 = vrot.slane %v53_v13, %v62_v12  ;;  %v133_v23 = vrot.slane %v53_v13, %v132_v22  ;;  %v216_v39 = vrot.slane %v53_v13, %v215_v38  ;;  %v276_v48 = vrot.slane %v53_v13, %v275_v47 }
  0x2c   :  { %386 = vmatpush3.bf16.msra.mxu0 %v426_v2  ;;  %394 = vmatpush3.bf16.msra.mxu1 %v428_v5  ;;  %p507_p4 = por %p506_p3, %p505_p2 }
  0x2d   :  { %403 = vmatprep.subr.bf16.mxu0 %v531_v0  ;;  %395 = vmatprep.subr.bf16.mxu1 %v531_v0 }
  0x2e   :  { %p508_p5 = pnand %p507_p4, %p501_p1 }
  0x2f   :  { %388 = vmatmul.mubr.msk.bf16.vlgmr.msra.gmra.mxu0 %vm76_vm1, %v59_v6 }
  0x30   :  { %405 = vmatprep.mubr.msk.bf16.mxu0 %vm532_vm0, %v531_v0  ;;  %396 = vmatpush3.bf16.msra.mxu1 %v429_v7 }
  0x31   :  { %397 = vmatprep.subr.bf16.mxu1 %v531_v0  ;;  %404 = vmatpush3.bf16.msra.mxu0 %v431_v9 }
  0x32   :  { %409 = vmatprep.subr.bf16.mxu0 %v531_v0 }
  0x34   :  { %398 = vmatpush3.bf16.msra.mxu1 %v430_v8 }
  0xef   :  { %v114_v15 = vpop.f32.mrf.mxu0 }
  0xf0   :  { %v115_v16 = vadd.f32 %v114_v15, %v63_v14 }
  0xf1   :  { %v389_v17 = vpop.f32.mrf.mxu0 }
  0xf2   :  { %v120_v18 = vmax.f32 %v115_v16, 0.0 }
  0xf3   :  { %v117_v19 = vpop.f32.mrf.mxu0 }
  0xf4   :  { %v129_v20 = vpack.c.bf16 %v120_v18, %v120_v18 }
  0xf5   :  { %v390_v21 = vpop.f32.mrf.mxu0 }
  0xf6   :  { %400 = vmatmul.mubr.msk.bf16.vlgmr.msra.gmra.mxu1 %vm158_vm2, %v129_v20 }
 0x1b6   :  { %v196_v24 = vpop.f32.mrf.mxu1 }
 0x1b7   :  { %v197_v25 = vadd.f32 %v196_v24, %v133_v23 }
 0x1b8   :  { %v401_v26 = vpop.f32.mrf.mxu1 }
 0x1b9   :  { %v202_v27 = vmax.f32 %v197_v25, 0.0 }
 0x1ba   :  { %v199_v28 = vpop.f32.mrf.mxu1 }
 0x1bb   :  { %v212_v29 = vpack.c.bf16 %v202_v27, %v202_v27  ;;  %v203_v30 = vmul.f32 %v202_v27, %v202_v27 }
 0x1bc   :  { %v402_v31 = vpop.f32.mrf.mxu1 }
 0x1bd   :  { %204 = vadd.xlane.f32.xlu0 %v203_v30  ;;  %406 = vmatmul.mubr.msk.bf16.vlgmr.msra.gmra.mxu0 %vm223_vm3, %v212_v29 }
 0x1be   :  { %413 = vmatprep.mubr.msk.bf16.mxu0 %vm532_vm0, %v531_v0  ;;  %410 = vmatpush3.bf16.msra.mxu0 %v432_v32 }
 0x1bf   :  { %411 = vmatprep.subr.bf16.mxu0 %v531_v0 }
 0x1c2   :  { %412 = vmatpush3.bf16.msra.mxu0 %v433_v33 }
 0x246   :  { %v205_v34 = vpop.xlane.xlu0 %204 }
 0x247   :  { %v206_v35 = vmax.f32 %v205_v34, 1e-24 }
 0x249   :  { %434 = vrsqrt.f32 %v206_v35 }
 0x256   :  { %v435_v36 = vpop.eup %434 }
 0x257   :  { %v208_v37 = vmul.f32 %v435_v36, %v202_v27 }
 0x259   :  { %209 = vst [vmem:[#allocation8] sm:$0xff] %v208_v37 }
 0x27d   :  { %v261_v40 = vpop.f32.mrf.mxu0 }
 0x27e   :  { %v262_v41 = vadd.f32 %v261_v40, %v216_v39 }
 0x27f   :  { %v407_v42 = vpop.f32.mrf.mxu0 }
 0x280   :  { %v267_v43 = vmax.f32 %v262_v41, 0.0 }
 0x281   :  { %v264_v44 = vpop.f32.mrf.mxu0 }
 0x282   :  { %v272_v45 = vpack.c.bf16 %v267_v43, %v267_v43 }
 0x283   :  { %v408_v46 = vpop.f32.mrf.mxu0 }
 0x284   :  { %414 = vmatmul.mubr.msk.bf16.vlgmr.msra.gmra.mxu0 %vm76_vm1, %v272_v45 }
 0x344   :  { %v326_v49 = vpop.f32.mrf.mxu0 }
 0x345   :  { %v327_v50 = vadd.f32 %v326_v49, %v276_v48 }
 0x346   :  { %v415_v51 = vpop.f32.mrf.mxu0 }
 0x347   :  { %v332_v52 = vmax.f32 %v327_v50, 0.0 }
 0x348   :  { %v329_v53 = vpop.f32.mrf.mxu0 }
 0x349   :  { %v369_v54 = vmul.f32 -1.442695, %v332_v52 }
 0x34a   :  { %v416_v55 = vpop.f32.mrf.mxu0 }
 0x34b   :  { %436 = vpow2.f32 %v369_v54 }
 0x358   :  { %v437_v56 = vpop.eup %436 }
 0x359   :  { %v336_v57 = vadd.f32 1.0, %v437_v56 }
 0x35b   :  { %438 = vrcp.f32 %v336_v57 }
 0x368   :  { %v439_v58 = vpop.eup %438 }
 0x369   :  { %339 = vst [vmem:[#allocation8 + $0x8] sm:$0xff] %v439_v58 }
 0x36a   :  { %511 = shalt.err (!%p508_p5)
}
 0x36b   :  { %349 = dma.vmem_to_hbm [thread:$0]  %s347_s2, 256, %s575_s3, [#allocation4]  }
 0x36c   :  { %524 = dma.done.wait [#allocation4], 256  }
 0x36d   :  { %525 = vsyncadd [#allocation4], 4294967040 }
 0x36e   :  { %353 = vsyncpa [#allocation3], 1 }
 0x36f   :  { %354 = vsyncpa [#allocation6], 1 }
 0x370   :  { %355 = vsyncpa [#allocation4], 1 }

</bundles_post_ra>
